<compile_context>
chip_gen: v5e
topology: v5e:2x2
jax: 0.10.0
libtpu: 0.0.40
codegen_flags: <defaults>
</compile_context>

<pallas_src>
import jax
import jax.numpy as jnp
import numpy as np
from jax.experimental import pallas as pl
from jax.experimental.pallas import tpu as pltpu


def _make_kernel(c_in, c_out):
    use_vpu_contraction = c_in < 8   # tiny K wastes the MXU; do VPU mul-adds

    def kernel(x_ref, scale_ref, bias_ref, w_ref, o_ref):
        # x_ref:     (C_in, ts)    spatial tile, native NCHW layout
        # scale_ref: (C_in, 1)     folded BN scale  (gamma / sqrt(var + eps))
        # bias_ref:  (C_in, 1)     folded BN bias   (beta - mean * scale)
        # w_ref:     (C_out, C_in) 1x1 conv weight
        # o_ref:     (C_out, ts)
        x = x_ref[...].astype(jnp.float32)
        # BN affine in f32 (v5e VPU has no bf16 ALU); scale/bias broadcast
        # along the lane (spatial) axis.
        y = x * scale_ref[...] + bias_ref[...]
        y = jnp.maximum(y, 0.0)                       # ReLU (self.active)
        w = w_ref[...]
        if use_vpu_contraction:
            # K = C_in is tiny: unrolled VPU multiply-adds instead of MXU.
            acc = w[:, 0:1].astype(jnp.float32) * y[0:1, :]
            for c in range(1, c_in):
                acc = acc + w[:, c:c + 1].astype(jnp.float32) * y[c:c + 1, :]
            o_ref[...] = acc.astype(o_ref.dtype)
        else:
            # Feed the MXU in the weight's dtype (bf16 weights halve HBM /
            # VMEM traffic on v6e/v7x); accumulate in f32.
            o_ref[...] = jnp.dot(
                w, y.astype(w.dtype), preferred_element_type=jnp.float32,
            ).astype(o_ref.dtype)

    return kernel


def transition_c_forward(x_nchw, gamma, beta, running_mean, running_var,
                         conv_weight, *, eps=1e-5, spatial_tile=None):
    """Pallas implementation of TransitionC.forward (inference-mode BN)."""
    N, C, H, W = x_nchw.shape
    C_out = conv_weight.shape[0]
    HW = H * W

    # Fold BN into a per-channel affine (glue, plain JAX, negligible size).
    scale = (gamma / jnp.sqrt(running_var + eps)).astype(jnp.float32)
    bias = (beta - running_mean * scale).astype(jnp.float32)
    scale2d = scale.reshape(C, 1)
    bias2d = bias.reshape(C, 1)

    # Native layout: pure reshapes only -- no transpose, no pad.
    x_rows = x_nchw.reshape(N, C, HW)
    w = conv_weight.reshape(C_out, C)            # keep the caller's dtype

    # Spatial tile (lane dim): multiple of 128 for unmasked lane-dense stores,
    # large enough (>=512 when possible) to amortize the ~0.35us per-grid-step
    # overhead, small enough that double-buffered x/out tiles fit the default
    # scoped VMEM on every generation (v7x has only 64 MiB physical per TC).
    if spatial_tile is None:
        if HW <= 128:
            ts = HW                                    # full extent (always legal)
        else:
            budget = 20 * 1024 * 1024                  # activation VMEM budget
            per_col = 4 * 2 * (C + C_out)              # dbl-buffered x + out cols
            ts = min(HW, 2048, max(128, budget // per_col))
            ts -= ts % 128
    else:
        ts = spatial_tile

    grid = (N, pl.cdiv(HW, ts))                        # ragged last block OK

    out_dtype = x_nchw.dtype
    cost = pl.CostEstimate(
        flops=2 * N * HW * C * C_out,
        transcendentals=0,
        bytes_accessed=(x_rows.size * x_rows.dtype.itemsize
                        + w.size * w.dtype.itemsize
                        + (scale2d.size + bias2d.size) * 4
                        + N * C_out * HW * jnp.dtype(out_dtype).itemsize),
    )

    out = pl.pallas_call(
        _make_kernel(C, C_out),
        out_shape=jax.ShapeDtypeStruct((N, C_out, HW), out_dtype),
        grid_spec=pltpu.PrefetchScalarGridSpec(
            num_scalar_prefetch=0,
            grid=grid,
            in_specs=[
                pl.BlockSpec((None, C, ts), lambda n, s: (n, 0, s)),   # x tile
                pl.BlockSpec((C, 1), lambda n, s: (0, 0)),             # scale (resident)
                pl.BlockSpec((C, 1), lambda n, s: (0, 0)),             # bias  (resident)
                pl.BlockSpec((C_out, C), lambda n, s: (0, 0)),         # weight (resident)
            ],
            out_specs=pl.BlockSpec((None, C_out, ts), lambda n, s: (n, 0, s)),
        ),
        compiler_params=pltpu.CompilerParams(
            dimension_semantics=("parallel", "parallel"),  # shards over v7x's 2 TCs
            vmem_limit_bytes=48 * 1024 * 1024,
        ),
        cost_estimate=cost,
    )(x_rows, scale2d, bias2d, w)

    # (N, C_out, H*W) is already NCHW-flat: plain reshape, no transpose.
    return out.reshape(N, C_out, H, W)


def _reference(x_nchw, gamma, beta, mean, var, conv_weight, eps=1e-5):
    # Pure-JAX reference of the same forward semantics.
    scale = gamma / jnp.sqrt(var + eps)
    bias = beta - mean * scale
    y = x_nchw * scale[None, :, None, None] + bias[None, :, None, None]
    y = jnp.maximum(y, 0.0)
    w = conv_weight.reshape(conv_weight.shape[0], conv_weight.shape[1])
    return jnp.einsum("oc,nchw->nohw", w, y)


if __name__ == "__main__":
    key = jax.random.PRNGKey(0)
    k_x, k_g, k_b, k_m, k_v, k_w = jax.random.split(key, 6)

    N, C_in, H, W = 2, 4, 16, 16
    C_out = C_in * 2  # TransitionC.exp = 2

    x = jax.random.normal(k_x, (N, C_in, H, W), dtype=jnp.float32)

    # Deterministic synthetic parameters (BatchNorm2d + Conv2d(1x1, bias=False)).
    gamma = 1.0 + 0.1 * jax.random.normal(k_g, (C_in,), dtype=jnp.float32)
    beta = 0.1 * jax.random.normal(k_b, (C_in,), dtype=jnp.float32)
    running_mean = 0.1 * jax.random.normal(k_m, (C_in,), dtype=jnp.float32)
    running_var = 1.0 + 0.1 * jnp.abs(
        jax.random.normal(k_v, (C_in,), dtype=jnp.float32))
    conv_weight = (1.0 / np.sqrt(C_in)) * jax.random.normal(
        k_w, (C_out, C_in, 1, 1), dtype=jnp.float32)

    out = transition_c_forward(x, gamma, beta, running_mean, running_var,
                               conv_weight)
    out = jax.block_until_ready(out)

    ref = _reference(x, gamma, beta, running_mean, running_var, conv_weight)
    assert out.shape == (N, C_out, H, W), out.shape
    np.testing.assert_allclose(np.asarray(out), np.asarray(ref),
                               rtol=1e-5, atol=1e-5)

    print("KERNEL_OK")
</pallas_src>

<mosaic_0001>
module attributes {stable_mosaic.version = 11 : i64} {
  func.func @kernel(%arg0: i32, %arg1: i32, %arg2: memref<1x4x256xf32, #tpu.memory_space<vmem>>, %arg3: memref<4x1xf32, #tpu.memory_space<vmem>>, %arg4: memref<4x1xf32, #tpu.memory_space<vmem>>, %arg5: memref<8x4xf32, #tpu.memory_space<vmem>>, %arg6: memref<1x8x256xf32, #tpu.memory_space<vmem>>) attributes {dimension_semantics = [#tpu.dimension_semantics<parallel>, #tpu.dimension_semantics<parallel>], iteration_bounds = array<i64: 2, 1>, scalar_prefetch = 0 : i64, scratch_operands = 0 : i64, tpu.core_type = #tpu.core_type<tc>, window_params = [{transform_indices = @transform_0, window_bounds = array<i64: 1, 4, 256>}, {pipeline_mode = #tpu.pipeline_mode<synchronous>, transform_indices = @transform_1, window_bounds = array<i64: 4, 1>}, {pipeline_mode = #tpu.pipeline_mode<synchronous>, transform_indices = @transform_2, window_bounds = array<i64: 4, 1>}, {pipeline_mode = #tpu.pipeline_mode<synchronous>, transform_indices = @transform_3, window_bounds = array<i64: 8, 4>}, {transform_indices = @transform_4, window_bounds = array<i64: 1, 8, 256>}]} {
    %c0 = arith.constant 0 : index
    %c0_0 = arith.constant 0 : index
    %c0_1 = arith.constant 0 : index
    %0 = vector.load %arg2[%c0, %c0_0, %c0_1] : memref<1x4x256xf32, #tpu.memory_space<vmem>>, vector<1x4x256xf32>
    %1 = vector.shape_cast %0 : vector<1x4x256xf32> to vector<4x256xf32>
    %c0_2 = arith.constant 0 : index
    %c0_3 = arith.constant 0 : index
    %2 = vector.load %arg3[%c0_2, %c0_3] : memref<4x1xf32, #tpu.memory_space<vmem>>, vector<4x1xf32>
    %3 = vector.broadcast %2 : vector<4x1xf32> to vector<4x256xf32>
    %4 = arith.mulf %1, %3 : vector<4x256xf32>
    %c0_4 = arith.constant 0 : index
    %c0_5 = arith.constant 0 : index
    %5 = vector.load %arg4[%c0_4, %c0_5] : memref<4x1xf32, #tpu.memory_space<vmem>>, vector<4x1xf32>
    %6 = vector.broadcast %5 : vector<4x1xf32> to vector<4x256xf32>
    %7 = arith.addf %4, %6 : vector<4x256xf32>
    %cst = arith.constant 0.000000e+00 : f32
    %8 = vector.broadcast %cst : f32 to vector<4x256xf32>
    %9 = arith.maximumf %7, %8 : vector<4x256xf32>
    %c0_6 = arith.constant 0 : index
    %c0_7 = arith.constant 0 : index
    %10 = vector.load %arg5[%c0_6, %c0_7] : memref<8x4xf32, #tpu.memory_space<vmem>>, vector<8x4xf32>
    %11 = vector.extract_strided_slice %10 {offsets = [0, 0], sizes = [8, 1], strides = [1, 1]} : vector<8x4xf32> to vector<8x1xf32>
    %12 = vector.extract_strided_slice %9 {offsets = [0, 0], sizes = [1, 256], strides = [1, 1]} : vector<4x256xf32> to vector<1x256xf32>
    %13 = vector.broadcast %11 : vector<8x1xf32> to vector<8x256xf32>
    %14 = vector.broadcast %12 : vector<1x256xf32> to vector<8x256xf32>
    %15 = arith.mulf %13, %14 : vector<8x256xf32>
    %16 = vector.extract_strided_slice %10 {offsets = [0, 1], sizes = [8, 1], strides = [1, 1]} : vector<8x4xf32> to vector<8x1xf32>
    %17 = vector.extract_strided_slice %9 {offsets = [1, 0], sizes = [1, 256], strides = [1, 1]} : vector<4x256xf32> to vector<1x256xf32>
    %18 = vector.broadcast %16 : vector<8x1xf32> to vector<8x256xf32>
    %19 = vector.broadcast %17 : vector<1x256xf32> to vector<8x256xf32>
    %20 = arith.mulf %18, %19 : vector<8x256xf32>
    %21 = arith.addf %15, %20 : vector<8x256xf32>
    %22 = vector.extract_strided_slice %10 {offsets = [0, 2], sizes = [8, 1], strides = [1, 1]} : vector<8x4xf32> to vector<8x1xf32>
    %23 = vector.extract_strided_slice %9 {offsets = [2, 0], sizes = [1, 256], strides = [1, 1]} : vector<4x256xf32> to vector<1x256xf32>
    %24 = vector.broadcast %22 : vector<8x1xf32> to vector<8x256xf32>
    %25 = vector.broadcast %23 : vector<1x256xf32> to vector<8x256xf32>
    %26 = arith.mulf %24, %25 : vector<8x256xf32>
    %27 = arith.addf %21, %26 : vector<8x256xf32>
    %28 = vector.extract_strided_slice %10 {offsets = [0, 3], sizes = [8, 1], strides = [1, 1]} : vector<8x4xf32> to vector<8x1xf32>
    %29 = vector.extract_strided_slice %9 {offsets = [3, 0], sizes = [1, 256], strides = [1, 1]} : vector<4x256xf32> to vector<1x256xf32>
    %30 = vector.broadcast %28 : vector<8x1xf32> to vector<8x256xf32>
    %31 = vector.broadcast %29 : vector<1x256xf32> to vector<8x256xf32>
    %32 = arith.mulf %30, %31 : vector<8x256xf32>
    %33 = arith.addf %27, %32 : vector<8x256xf32>
    %c0_8 = arith.constant 0 : index
    %c0_9 = arith.constant 0 : index
    %c0_10 = arith.constant 0 : index
    %34 = vector.load %arg6[%c0_8, %c0_9, %c0_10] : memref<1x8x256xf32, #tpu.memory_space<vmem>>, vector<1x8x256xf32>
    %35 = vector.shape_cast %34 : vector<1x8x256xf32> to vector<8x256xf32>
    %36 = vector.shape_cast %33 : vector<8x256xf32> to vector<1x8x256xf32>
    tpu.vector_store %arg6[%c0_8, %c0_9, %c0_10], %36 {strides = array<i32>} : memref<1x8x256xf32, #tpu.memory_space<vmem>>, vector<1x8x256xf32>,
    return
  }
  func.func @transform_0(%arg0: i32, %arg1: i32) -> (i32, i32, i32) {
    %c0_i32 = arith.constant 0 : i32
    %c0_i32_0 = arith.constant 0 : i32
    return %arg0, %c0_i32, %arg1 : i32, i32, i32
  }
  func.func @transform_1(%arg0: i32, %arg1: i32) -> (i32, i32) {
    %c0_i32 = arith.constant 0 : i32
    %c0_i32_0 = arith.constant 0 : i32
    %c0_i32_1 = arith.constant 0 : i32
    return %c0_i32, %c0_i32_0 : i32, i32
  }
  func.func @transform_2(%arg0: i32, %arg1: i32) -> (i32, i32) {
    %c0_i32 = arith.constant 0 : i32
    %c0_i32_0 = arith.constant 0 : i32
    %c0_i32_1 = arith.constant 0 : i32
    return %c0_i32, %c0_i32_0 : i32, i32
  }
  func.func @transform_3(%arg0: i32, %arg1: i32) -> (i32, i32) {
    %c0_i32 = arith.constant 0 : i32
    %c0_i32_0 = arith.constant 0 : i32
    %c0_i32_1 = arith.constant 0 : i32
    return %c0_i32, %c0_i32_0 : i32, i32
  }
  func.func @transform_4(%arg0: i32, %arg1: i32) -> (i32, i32, i32) {
    %c0_i32 = arith.constant 0 : i32
    %c0_i32_0 = arith.constant 0 : i32
    return %arg0, %c0_i32, %arg1 : i32, i32, i32
  }
}

</mosaic_0001>

<bundles_post_ra>
// kernel: tpu_custom_call.1
= control target key start
LH: loop header
LB: loop body
LE: loop exit
PB: predicated region body
PF: predicated region fallthrough
CT: control target
= control target key end

     0   :  { %9 = vsyncpa [#allocation3], 0  ;;  %s706_s0 = inlined_call_operand.vmem [shape: f32[2,4,256], index: 0, kind: input, shape index: {}]   ;;  %s707_s1 = inlined_call_operand.vmem [shape: f32[4,1], index: 1, kind: input, shape index: {}]   ;;  %s708_s2 = inlined_call_operand.vmem [shape: f32[4,1], index: 2, kind: input, shape index: {}]   ;;  %s709_s3 = inlined_call_operand.vmem [shape: f32[8,4], index: 3, kind: input, shape index: {}]   ;;  %s710_s4 = inlined_call_operand.hbm [shape: f32[2,8,256], index: 4, kind: output, shape index: {}]  }
   0x1   :  { %11 = vsyncpa [#allocation3 + $0x1], 0  ;;  %s596_s15 = smov 0   ;;  %s598_s16 = smov 0  }
   0x2   :  { %s600_s17 = smov 0   ;;  %s602_s18 = smov 0  }
   0x3   :  { %s604_s19 = smov 0   ;;  %s606_s20 = smov 0  }
   0x4 LB: > { %s405_s21 = sadd.s32 4294967295, %s564_s20   ;;  %s406_s22 = sadd.s32 4294967294, %s564_s20   ;;  %s564_s20 = sphi %s606_s20, %s17_s20   ;;  %s560_s19 = sphi %s604_s19, %s717_s19   ;;  %s556_s18 = sphi %s602_s18, %s716_s18   ;;  %s552_s17 = sphi %s600_s17, %s715_s17   ;;  %s548_s16 = sphi %s598_s16, %s714_s16   ;;  %s544_s15 = sphi %s596_s15, %s713_s15  }
   0x5   : > { %s29_s23 = sadd.s32 1, %s560_s19  ;;  %s129_s24 = sadd.s32 1, %s552_s17 }
   0x6   : > { %p31_p0 = scmp.ge.s32.totalorder %s29_s23, 2  ;;  %p139_p1 = scmp.ne.s32.totalorder %s552_s17, %s548_s16 }
   0x7   : > { %p140_p2 = scmp.eq.s32.totalorder %s405_s21, 1  ;;  %p145_p3 = scmp.ne.s32.totalorder %s548_s16, %s544_s15 }
   0x8   : > { %s719_s23 = smov (%p31_p0, %s29_s23), 0  ;;  %p146_p5 = scmp.eq.s32.totalorder %s406_s22, 1 }
   0x9   : > { %p636_p4 = por %p140_p2, %p139_p1  ;;  %s124_s26 = ssub.s32 %s560_s19, %s719_s23 }
   0xa   : > { %p409_p6 = scmp.ge.s32.totalorder %s564_s20, 1  ;;  %p127_p7 = scmp.eq.s32.totalorder %s124_s26, 0 }
   0xb   : > { %p643_p8 = por %p146_p5, %p145_p3  ;;  %p186_p9 = scmp.lt.s32.totalorder %s564_s20, 3 }
   0xc   : > { %s649_s28 = scalar_select %p127_p7, %s552_s17, %s129_s24  }
   0xd   : > { %p187_p10 = pnand %p409_p6, %p186_p9 }
   0xe   : > { %p217_p11 = scmp.lt.s32.totalorder (!%p187_p10), %s556_s18, 1  ;;  %s213_s14 = sand.u32 (!%p187_p10), 1, %s548_s16  }
   0xf   : > { %190 = sbr.rel (%p187_p10) target bundleno = 168 (0xa8), region = 36  ;;  %s410_s21 = sshll.u32 (!%p187_p10), %s213_s14, 4 }
  0x10   : > { %s419_s22 = sshll.u32 (!%p187_p10), %s556_s18, 4  ;;  %s311_s6 = scalar_lea.sflag (!%p187_p10), [#allocation3], %s213_s14 }
  0x11   : > { %s324_s29 = scalar_lea.hbm (!%p187_p10), %s710_s4, %s419_s22  ;;  %s506_s11 = scalar_lea.hbm (!%p187_p10), %s710_s4, 32 }
  0x12   : > { %s328_s5 = sshll.u32 (!%p187_p10), %s324_s29, 4  ;;  %s329_s5 = int_to_ptr.hbm [resolvable:$true] %s328_s5 }
  0x13   : > { %s500_s7 = sshra.s32 (!%p187_p10), %s329_s5, 4  ;;  %s501_s7 = int_to_ptr.hbm [resolvable:$true] %s500_s7 }
  0x14   : > { %v228_v0 = vld [vmem:[%s707_s1] sm:$0xf]  ;;  %v566_v2 = vmov 0   ;;  %v567_v3 = vmov 2   ;;  %v568_v5 = vmov 1   ;;  %v569_v6 = vmov 3   ;;  %p507_p1 = scmp.lt.s32.totalorder %s501_s7, %s710_s4 }
  0x15   : > { %v251_v1 = vld [vmem:[%s709_s3] sm:$0xff]  ;;  %480 = vset.pattern.permute.xlu0 %v566_v2  ;;  %481 = vset.pattern.permute.xlu1 %v566_v2  ;;  %s218_s9 = scalar_select %p217_p11, %s556_s18, 1  ;;  %v570_v7 = vmov 839922192  }
  0x16   : > { %231 = vperm.xlu0 %480, %v228_v0   ;;  %254 = vperm.xlu1 %481, %v251_v1   ;;  %v239_v4 = vld [vmem:[%s708_s2] sm:$0xf]  ;;  %v234_v8 = vunpack.c.l.s4 %v570_v7  ;;  %s215_s18 = scalar_lea.vmem [#allocation2], %s410_s21  ;;  %s502_s8 = scalar_lea.hbm %s501_s7, 16 }
  0x17   : > { %483 = vset.pattern.permute.xlu2 %v567_v3  ;;  %s418_s10 = sshll.u32 %s218_s9, 3  ;;  %s326_s30 = sshll.u32 %s215_s18, 4  ;;  %s327_s30 = int_to_ptr.vmem [resolvable:$true] %s326_s30 }
  0x18   : > { %281 = vperm.xlu2 %483, %v251_v1   ;;  %v235_v10 = vunpack.c.0.s8 %v234_v8  ;;  %s224_s13 = scalar_lea.vmem %s706_s0, %s418_s10  ;;  %p503_p12 = scmp.ne.s32.totalorder %s501_s7, %s502_s8 }
  0x19   : > { %v227_v12 = vld [vmem:[%s224_s13] sm:$0xff]  ;;  %p508_p2 = scmp.lt.s32.totalorder %s506_s11, %s502_s8 }
  0x1a   : > { %p504_p13 = pnand %p503_p12, %p636_p4 }
  0x1b   : > { %p509_p3 = por %p508_p2, %p507_p1 }
  0x1c   : > { %p505_p0 = pneg %p504_p13 }
  0x1e   : > { %242 = vperm.xlu0 %480, %v239_v4   ;;  %482 = vset.pattern.permute.xlu1 %v568_v5  ;;  %p510_p5 = pnand %p509_p3, %p505_p0 }
  0x1f   : > { %267 = vperm.xlu1 %482, %v251_v1  }
  0x20   : > { %484 = vset.pattern.permute.xlu2 %v569_v6 }
  0x21   : > { %295 = vperm.xlu2 %484, %v251_v1  }
  0x26   : > { %485 = vset.pattern.permute.xlu0 %v569_v6 }
  0x72   : > { %v282_v18 = vpop.permute.xlu2 %281 }
  0x7b   : > { %v296_v41 = vpop.permute.xlu2 %295 }
  0x88   : > { %v232_v9 = vpop.permute.xlu0 %231  ;;  %v255_v13 = vpop.permute.xlu1 %254 }
  0x89   : > { %v236_v11 = vperm.slane %v232_v9, %v235_v10 }
  0x8b   : > { %v238_v15 = vmul.f32 %v236_v11, %v227_v12 }
  0x90   : > { %v243_v14 = vpop.permute.xlu0 %242 }
  0x91   : > { %v247_v16 = vperm.slane %v243_v14, %v235_v10  ;;  %v268_v30 = vpop.permute.xlu1 %267 }
  0x93   : > { %v249_v17 = vadd.f32 %v247_v16, %v238_v15 }
  0x95   : > { %v250_v19 = vmax.f32 %v249_v17, 0.0 }
  0x97   : > { %v258_v20 = vperm.slane %v250_v19, 0  ;;  %v259_v21 = vperm.slane %v250_v19, 4  ;;  %v284_v22 = vperm.slane %v250_v19, 2  ;;  %v285_v23 = vperm.slane %v250_v19, 6 }
  0x98   : > { %v298_v24 = vperm.slane %v250_v19, 3  ;;  %v299_v25 = vperm.slane %v250_v19, 7  ;;  %v270_v26 = vperm.slane %v250_v19, 1  ;;  %v271_v27 = vperm.slane %v250_v19, 5 }
  0x99   : > { %v262_v28 = vperm.slane %v258_v20, 0  ;;  %v263_v29 = vperm.slane %v259_v21, 0  ;;  %v288_v31 = vperm.slane %v284_v22, 2  ;;  %v289_v32 = vperm.slane %v285_v23, 2 }
  0x9a   : > { %v274_v33 = vperm.slane %v270_v26, 1  ;;  %v275_v34 = vperm.slane %v271_v27, 1  ;;  %v302_v37 = vperm.slane %v298_v24, 3  ;;  %v303_v38 = vperm.slane %v299_v25, 3 }
  0x9b   : > { %v264_v35 = vmul.f32 %v262_v28, %v255_v13  ;;  %v265_v36 = vmul.f32 %v263_v29, %v255_v13  ;;  %v290_v42 = vmul.f32 %v288_v31, %v282_v18  ;;  %v291_v43 = vmul.f32 %v289_v32, %v282_v18 }
  0x9c   : > { %v276_v39 = vmul.f32 %v274_v33, %v268_v30  ;;  %v277_v40 = vmul.f32 %v275_v34, %v268_v30  ;;  %v304_v46 = vmul.f32 %v302_v37, %v296_v41  ;;  %v305_v47 = vmul.f32 %v303_v38, %v296_v41 }
  0x9e   : > { %v278_v44 = vadd.f32 %v276_v39, %v264_v35  ;;  %v279_v45 = vadd.f32 %v277_v40, %v265_v36 }
  0xa0   : > { %v292_v48 = vadd.f32 %v290_v42, %v278_v44  ;;  %v293_v49 = vadd.f32 %v291_v43, %v279_v45 }
  0xa2   : > { %v306_v50 = vadd.f32 %v304_v46, %v292_v48  ;;  %v307_v51 = vadd.f32 %v305_v47, %v293_v49 }
  0xa4   : > { %308 = vst [vmem:[%s215_s18] sm:$0xff] %v306_v50 }
  0xa5   : > { %309 = vst [vmem:[%s215_s18 + $0x8] sm:$0xff] %v307_v51 }
  0xa6   : > { %513 = shalt.err (!%p510_p5)
}
  0xa7   : > { %420 = dma.vmem_to_hbm [thread:$0]  (%p636_p4), %s327_s30, 256, %s329_s5, %s311_s6  }
  0xa8 PF: > { %p426_p6 = scmp.ge.s32.totalorder %s564_s20, 2  ;;  %s340_s14 = sand.u32 1, %s544_s15  }
  0xa9   : > { %s341_s21 = scalar_lea.sflag [#allocation3], %s340_s14 }
  0xaa   : > { %p423_p7 = pnand %p426_p6, %p643_p8 }
  0xac   : > { %p424_p9 = pneg %p423_p7 }
  0xae   : > { %539 = dma.done.wait (%p424_p9), %s341_s21, 256  }
  0xaf   : > { %541 = vsyncadd (%p424_p9), %s341_s21, 4294967040  ;;  %s17_s20 = sadd.s32 1, %s564_s20   ;;  %s713_s15 = smov %s548_s16 }
  0xb0   : > { %p14_p10 = scmp.ge.s32.totalorder %s17_s20, 4   ;;  %s714_s16 = smov %s552_s17 }
  0xb1   : > { %s715_s17 = smov %s649_s28  ;;  %s716_s18 = smov %s560_s19 }
  0xb2   : > { %s717_s19 = smov %s719_s23  ;;  %16 = sbr.rel (!%p14_p10) target bundleno = 4 (0x4), region = 71 }
  0xb7   :  { %347 = vsyncpa [#allocation3], 1 }
  0xb8   :  { %349 = vsyncpa [#allocation3 + $0x1], 1 }

</bundles_post_ra>
